<compile_context>
chip_gen: v7x
topology: tpu7x:2x2x1
jax: 0.10.0
libtpu: 0.0.40
codegen_flags: <defaults>
</compile_context>

<pallas_src>
import functools

import jax
import jax.numpy as jnp
from jax.experimental import pallas as pl
from jax.experimental.pallas import tpu as pltpu


def _round_up(x, m):
    return (x + m - 1) // m * m


def _int_pow(x, n):
    """x ** n for static integer n >= 1 via repeated multiplication (VPU only)."""
    result = None
    base = x
    while n > 0:
        if n & 1:
            result = base if result is None else result * base
        n >>= 1
        if n:
            base = base * base
    return result


def _gem_kernel(p_ref, x_ref, o_ref, *, eps, inv_hw, hw_valid, hw_padded, p_int):
    # p_ref: (1,) f32 in SMEM; x_ref: (R, HW_pad) tile in VMEM; o_ref: (R, 1).
    x = x_ref[...].astype(jnp.float32)
    xc = jnp.maximum(x, eps)                       # clamp(min=eps)  (> 0)

    if p_int is not None:
        # Static integer-p fast path (default p=3): pure VPU multiplies.
        xp = _int_pow(xc, p_int)
        inv_p = jnp.float32(1.0 / p_int)
    else:
        # Dynamic (float) p: one log + one exp per element (EUP path).
        p = p_ref[0]
        xp = jnp.exp(p * jnp.log(xc))
        inv_p = 1.0 / p                            # scalar divide, once per block

    if hw_valid != hw_padded:
        # Spatial axis was padded up to a lane multiple; zero the pad columns
        # so they do not contribute to the pooled sum.
        lane = jax.lax.broadcasted_iota(jnp.int32, xp.shape, dimension=1)
        xp = jnp.where(lane < hw_valid, xp, 0.0)

    # Mean over the true H*W elements (trace-time constant 1/HW), then m**(1/p).
    m = jnp.sum(xp, axis=-1, keepdims=True) * inv_hw        # (R, 1), m > 0
    y = jnp.exp(jnp.log(m) * inv_p)                          # per-row only
    o_ref[...] = y.astype(o_ref.dtype)


def gem_forward(x_nchw, p, eps=1e-6, p_static=None):
    """GeM pooling.

    x_nchw: (N, C, H, W) float array.
    p:      (1,) float32 parameter (runtime value).
    p_static: optional Python number; if it is an integer (e.g. 3, the module
        default), an integer-power fast path is compiled in.  Results must
        match `p`'s runtime value for correctness.
    Returns (N, C, 1, 1), matching F.avg_pool2d(x.clamp(eps)**p, (H,W))**(1/p).
    """
    N, C, H, W = x_nchw.shape
    rows, hw = N * C, H * W
    x2 = x_nchw.reshape(rows, hw)

    # Pad spatial axis to a lane multiple (128); pad rows to the row tile.
    hw_pad = _round_up(hw, 128)

    # Row tile: multiple of 8 sublanes, input block capped at ~2 MiB so the
    # double-buffered pipeline fits comfortably in scoped VMEM on every
    # generation (incl. v7x's 64 MiB physical VMEM).
    target_block_bytes = 2 * 1024 * 1024
    r = max(8, (target_block_bytes // (hw_pad * 4)) // 8 * 8)
    R = min(r, _round_up(rows, 8))
    rows_pad = _round_up(rows, R)

    if (rows_pad, hw_pad) != (rows, hw):
        x2 = jnp.pad(x2, ((0, rows_pad - rows), (0, hw_pad - hw)),
                     constant_values=1.0)

    p_int = None
    if p_static is not None and float(p_static) == int(p_static) and int(p_static) >= 1:
        p_int = int(p_static)

    p_arr = jnp.asarray(p, dtype=jnp.float32).reshape(1)

    kernel = functools.partial(
        _gem_kernel,
        eps=float(eps),
        inv_hw=float(1.0 / hw),
        hw_valid=hw,
        hw_padded=hw_pad,
        p_int=p_int,
    )

    grid = (rows_pad // R,)
    out = pl.pallas_call(
        kernel,
        out_shape=jax.ShapeDtypeStruct((rows_pad, 1), x2.dtype),
        grid=grid,
        in_specs=[
            pl.BlockSpec(memory_space=pltpu.MemorySpace.SMEM),   # p scalar
            pl.BlockSpec((R, hw_pad), lambda i: (i, 0)),         # row tile
        ],
        out_specs=pl.BlockSpec((R, 1), lambda i: (i, 0)),
        compiler_params=pltpu.CompilerParams(
            dimension_semantics=("parallel",),                   # megacore on v7x
        ),
    )(p_arr, x2)

    return out[:rows].reshape(N, C, 1, 1)


if __name__ == "__main__":
    # Deterministic parameter init, matching GeM.__init__(p=3, eps=1e-6).
    p_param = jnp.ones((1,), dtype=jnp.float32) * 3.0
    eps = 1e-6

    key = jax.random.PRNGKey(0)

    # Case 1: 16x16 spatial (lane-aligned), static integer-p fast path (p=3).
    x = jax.random.normal(key, (2, 4, 16, 16), dtype=jnp.float32)
    y = gem_forward(x, p_param, eps=eps, p_static=3)
    y = jax.block_until_ready(y)
    ref = jnp.mean(jnp.maximum(x, eps) ** p_param[0], axis=(2, 3),
                   keepdims=True) ** (1.0 / p_param[0])
    assert y.shape == (2, 4, 1, 1)
    assert jnp.allclose(y, ref, atol=1e-5, rtol=1e-5)

    # Case 2: realistic 7x7 feature map (H*W=49, not a lane multiple) and the
    # dynamic-p (exp/log) path — exercises the spatial-pad masking.
    x2 = jax.random.normal(jax.random.PRNGKey(1), (2, 4, 7, 7), dtype=jnp.float32)
    y2 = gem_forward(x2, p_param, eps=eps)
    y2 = jax.block_until_ready(y2)
    ref2 = jnp.mean(jnp.maximum(x2, eps) ** p_param[0], axis=(2, 3),
                    keepdims=True) ** (1.0 / p_param[0])
    assert y2.shape == (2, 4, 1, 1)
    assert jnp.allclose(y2, ref2, atol=1e-4, rtol=1e-4)

    print("KERNEL_OK")
</pallas_src>

<mosaic_0001>
module attributes {stable_mosaic.version = 11 : i64} {
  func.func @_gem_kernel(%arg0: i32, %arg1: memref<1xf32, #tpu.memory_space<smem>>, %arg2: memref<8x256xf32, #tpu.memory_space<vmem>>, %arg3: memref<8x1xf32, #tpu.memory_space<vmem>>) attributes {dimension_semantics = [#tpu.dimension_semantics<parallel>], iteration_bounds = array<i64: 1>, scalar_prefetch = 0 : i64, scratch_operands = 0 : i64, tpu.core_type = #tpu.core_type<tc>, window_params = [{transform_indices = @transform_0, window_bounds = array<i64: 1>}, {transform_indices = @transform_1, window_bounds = array<i64: 8, 256>}, {transform_indices = @transform_2, window_bounds = array<i64: 8, 1>}]} {
    %c0 = arith.constant 0 : index
    %c0_0 = arith.constant 0 : index
    %0 = vector.load %arg2[%c0, %c0_0] : memref<8x256xf32, #tpu.memory_space<vmem>>, vector<8x256xf32>
    %cst = arith.constant 9.99999997E-7 : f32
    %1 = vector.broadcast %cst : f32 to vector<8x256xf32>
    %2 = arith.maximumf %0, %1 : vector<8x256xf32>
    %3 = arith.mulf %2, %2 : vector<8x256xf32>
    %4 = arith.mulf %2, %3 : vector<8x256xf32>
    %cst_1 = arith.constant dense<0.000000e+00> : vector<8xf32>
    %5 = vector.multi_reduction <add>, %4, %cst_1 [1] : vector<8x256xf32> to vector<8xf32>
    %6 = vector.shape_cast %5 : vector<8xf32> to vector<8x1xf32>
    %cst_2 = arith.constant 3.906250e-03 : f32
    %7 = vector.broadcast %cst_2 : f32 to vector<8x1xf32>
    %8 = arith.mulf %6, %7 : vector<8x1xf32>
    %9 = math.log %8 : vector<8x1xf32>
    %cst_3 = arith.constant 0.333333343 : f32
    %10 = vector.broadcast %cst_3 : f32 to vector<8x1xf32>
    %11 = arith.mulf %9, %10 : vector<8x1xf32>
    %12 = math.exp %11 : vector<8x1xf32>
    %c0_4 = arith.constant 0 : index
    %c0_5 = arith.constant 0 : index
    %13 = vector.load %arg3[%c0_4, %c0_5] : memref<8x1xf32, #tpu.memory_space<vmem>>, vector<8x1xf32>
    tpu.vector_store %arg3[%c0_4, %c0_5], %12 {strides = array<i32>} : memref<8x1xf32, #tpu.memory_space<vmem>>, vector<8x1xf32>,
    return
  }
  func.func @transform_0(%arg0: i32) -> i32 {
    %c0_i32 = arith.constant 0 : i32
    %c0_i32_0 = arith.constant 0 : i32
    return %c0_i32 : i32
  }
  func.func @transform_1(%arg0: i32) -> (i32, i32) {
    %c0_i32 = arith.constant 0 : i32
    %c0_i32_0 = arith.constant 0 : i32
    return %arg0, %c0_i32 : i32, i32
  }
  func.func @transform_2(%arg0: i32) -> (i32, i32) {
    %c0_i32 = arith.constant 0 : i32
    %c0_i32_0 = arith.constant 0 : i32
    return %arg0, %c0_i32 : i32, i32
  }
}

</mosaic_0001>

<bundles_post_ra>
// kernel: tpu_custom_call.1
= control target key start
LH: loop header
LB: loop body
LE: loop exit
PB: predicated region body
PF: predicated region fallthrough
CT: control target
= control target key end

     0   :  { %8 = vsyncpa [#allocation4], 0  ;;  %s77_s9 = smov [#allocation3]   ;;  %s108_s0 = inlined_call_operand.<no memory space> [shape: f32[1], index: 0, kind: input, shape index: {}]   ;;  %s109_s1 = inlined_call_operand.hbm [shape: f32[8,256], index: 1, kind: input, shape index: {}]   ;;  %s110_s2 = inlined_call_operand.vmem [shape: f32[8,1], index: 2, kind: output, shape index: {}]  }
   0x1   :  { %s17_s10 = sshll.u32 %s77_s9, 4  ;;  %s53_s13 = scalar_lea.hbm %s109_s1, 256  ;;  %s18_s10 = int_to_ptr.vmem [resolvable:$true] %s17_s10 }
   0x2   :  { %p54_p0 = scmp.ne.s32.totalorder %s109_s1, %s53_s13  ;;  %p57_p1 = scmp.lt.u32.totalorder %s53_s13, %s109_s1 }
   0x4   :  { %p59_p2 = pnand %p57_p1, %p54_p0 }
   0x6   :  { %62 = shalt.err (!%p59_p2)
}
   0x7   :  { %s63_s17 = scalar_lea.vmem %s18_s10, 256  ;;  %p68_p4 = scmp.lt.s32.totalorder %s18_s10, %s18_s10 }
   0x8   :  { %p64_p3 = scmp.ne.s32.totalorder %s18_s10, %s63_s17  ;;  %p69_p5 = scmp.lt.s32.totalorder %s63_s17, %s63_s17 }
   0xa   :  { %p70_p6 = por %p69_p5, %p68_p4 }
   0xc   :  { %p71_p7 = pnand %p70_p6, %p64_p3 }
   0xe   :  { %74 = shalt.err (!%p71_p7)
}
   0xf   :  { %20 = dma.hbm_to_vmem [thread:$0]  %s109_s1, 256, %s18_s10, [#allocation4]  }
  0x10   :  { %75 = dma.done.wait [#allocation4], 256  }
  0x11   :  { %76 = vsyncadd [#allocation4], 4294967040  ;;  %v24_v0 = vld [vmem:[#allocation3] sm:$0xff]  ;;  %v25_v1 = vld [vmem:[#allocation3 + $0x8] sm:$0xff]  ;;  %vm41_vm0 = vcmask 7168  }
  0x12   :  { %v26_v2 = vmax.f32 %v24_v0, 1e-06  ;;  %v27_v3 = vmax.f32 %v25_v1, 1e-06 }
  0x14   :  { %v28_v4 = vmul.f32 %v26_v2, %v26_v2  ;;  %v29_v5 = vmul.f32 %v27_v3, %v27_v3 }
  0x16   :  { %v30_v6 = vmul.f32 %v28_v4, %v26_v2  ;;  %v31_v7 = vmul.f32 %v29_v5, %v27_v3 }
  0x18   :  { %v32_v8 = vadd.f32 %v31_v7, %v30_v6 }
  0x1a   :  { %33 = vadd.xlane.f32.xlu0 %v32_v8 }
  0xa7   :  { %v34_v9 = vpop.xlane.xlu0 %33 }
  0xa8   :  { %v35_v10 = vmul.f32 0.00390625, %v34_v9 }
  0xaa   :  { %49 = vlog2.f32 %v35_v10 }
  0xb4   :  { %v50_v11 = vpop.eup %49 }
  0xb5   :  { %v37_v12 = vmul.f32 0.6931472, %v50_v11 }
  0xb7   :  { %v38_v13 = vmul.f32 0.33333334, %v37_v12 }
  0xb9   :  { %v39_v14 = vmul.f32 1.442695, %v38_v13 }
  0xbb   :  { %51 = vpow2.f32 %v39_v14 }
  0xc5   :  { %v52_v15 = vpop.eup %51 }
  0xc6   :  { %42 = vst.msk [vmem:[%s110_s2] sm:$0xff] %vm41_vm0, %v52_v15 }
  0xc7   :  { %47 = vsyncpa [#allocation4], 1 }

</bundles_post_ra>
